<compile_context>
chip_gen: v7x
topology: tpu7x:2x2x1
jax: 0.10.0
libtpu: 0.0.40
codegen_flags: <defaults>
</compile_context>

<pallas_src>
import jax
import jax.numpy as jnp
from jax.experimental import pallas as pl
from jax.experimental.pallas import tpu as pltpu


def _round_up(a, m):
    return pl.cdiv(a, m) * m


def _fc_kernel(x_ref, w1_ref, b1_ref, w2_ref, b2_ref, w3_ref, b3_ref, o_ref):
    cdt = w1_ref.dtype  # MXU operand dtype (bf16 by default; f32 optional)
    x = x_ref[...].astype(cdt)
    # Layer 1: Linear + ReLU (f32 accumulation + f32 epilogue, cast back for MXU).
    h1 = jnp.dot(x, w1_ref[...], preferred_element_type=jnp.float32)
    h1 = jnp.maximum(h1 + b1_ref[...], 0.0).astype(cdt)
    # Layer 2: Linear + ReLU.
    h2 = jnp.dot(h1, w2_ref[...], preferred_element_type=jnp.float32)
    h2 = jnp.maximum(h2 + b2_ref[...], 0.0).astype(cdt)
    # Output layer: Linear only.  Narrow (Dout) store: lane-masked vst, but the
    # HBM writeback is exactly B*Dout*4 bytes (no lane padding).
    out = jnp.dot(h2, w3_ref[...], preferred_element_type=jnp.float32)
    o_ref[...] = (out + b3_ref[...]).astype(o_ref.dtype)


def _vmem_capacity_bytes():
    """Per-core VMEM capacity; conservative fallback = 64 MiB (v7x size)."""
    try:
        cap = int(pltpu.get_tpu_info().vmem_capacity_bytes)
        if cap > 0:
            return cap
    except Exception:
        pass
    return 64 * 1024 * 1024


def fc_network(x, params, *, batch_tile=None, compute_dtype=jnp.bfloat16):
    """Fused forward pass of FCNetwork.

    x:       (B, dim_input) float32
    params:  dict with w1 (Din,H1), b1 (H1,), w2 (H1,H2), b2 (H2,),
             w3 (H2,Dout), b3 (Dout,)
    compute_dtype: MXU operand dtype (default bf16 -- native fast path on
             v5e/v6e/v7x).  Accumulation and the bias/ReLU epilogue stay f32;
             output matches x.dtype.  Pass jnp.float32 for exact f32 math.
    """
    B, Din = x.shape
    out_dtype = x.dtype
    cdt = jnp.dtype(compute_dtype) if compute_dtype is not None else jnp.dtype(x.dtype)

    w1, b1 = params["w1"], params["b1"]
    w2, b2 = params["w2"], params["b2"]
    w3, b3 = params["w3"], params["b3"]
    H1, H2, Dout = w1.shape[1], w2.shape[1], w3.shape[1]

    # Weights to compute dtype (tiny, one-time); biases stay f32 (added post-acc).
    w1c, w2c, w3c = w1.astype(cdt), w2.astype(cdt), w3.astype(cdt)
    b1r = b1.astype(jnp.float32).reshape(1, H1)
    b2r = b2.astype(jnp.float32).reshape(1, H2)
    b3r = b3.astype(jnp.float32).reshape(1, Dout)

    x_isz = jnp.dtype(x.dtype).itemsize
    o_isz = jnp.dtype(out_dtype).itemsize
    c_isz = cdt.itemsize
    # Sublane packing requirement of the narrowest dtype touching a row block.
    min_isz = min(c_isz, x_isz)
    sublane = 8 if min_isz >= 4 else (16 if min_isz == 2 else 32)

    # ---- VMEM budget (generation-aware cap with headroom for compiler scratch).
    vmem_cap = _vmem_capacity_bytes()
    vmem_budget = (vmem_cap * 3) // 4  # ~48 MiB on v7x, ~96 MiB on v5e/v6e
    # Constant-index weight/bias blocks (conservatively counted double-buffered).
    weight_bytes = (2 * (Din * H1 + H1 * H2 + H2 * Dout) * c_isz
                    + 2 * (H1 + H2 + Dout) * 4)
    # Per batch-row: double-buffered x tile + out tile, plus f32/bf16 intermediates.
    per_row_bytes = (2 * Din * x_isz + 2 * Dout * o_isz
                     + (H1 + H2) * (4 + c_isz))

    # ---- batch tiling --------------------------------------------------------
    if batch_tile is None:
        if B <= 512:
            batch_tile = B  # single block; full-dim rows need no alignment/padding
        else:
            # >= 2 grid steps (v7x has 2 TensorCores), 256..1024 rows (v6e roofline
            # sweet spot), sublane aligned, and shrunk to fit the VMEM budget.
            bt = min(1024, max(256, _round_up(pl.cdiv(B, 2), sublane)))
            avail = vmem_budget - weight_bytes
            if avail > 0:
                rows_fit = (avail // max(per_row_bytes, 1)) // sublane * sublane
                if rows_fit >= sublane:
                    bt = min(bt, rows_fit)
            batch_tile = max(sublane, (bt // sublane) * sublane)
    else:
        batch_tile = max(1, min(int(batch_tile), B))
        if batch_tile != B and batch_tile % sublane != 0:
            # e.g. user tile 8 with bf16 packing -> round to 16 to keep (16,128) tiles
            batch_tile = min(_round_up(batch_tile, sublane), B)

    grid = (pl.cdiv(B, batch_tile),)  # ragged tail handled by boundary-block masking

    vmem_need = weight_bytes + batch_tile * per_row_bytes
    vmem_limit = int(min(max(2 * vmem_need, 32 * 1024 * 1024), vmem_budget))

    cost = pl.CostEstimate(
        flops=2 * B * (Din * H1 + H1 * H2 + H2 * Dout),
        transcendentals=0,
        bytes_accessed=(B * Din * x_isz + B * Dout * o_isz
                        + (Din * H1 + H1 * H2 + H2 * Dout) * c_isz
                        + (H1 + H2 + Dout) * 4),
    )

    return pl.pallas_call(
        _fc_kernel,
        out_shape=jax.ShapeDtypeStruct((B, Dout), out_dtype),
        grid_spec=pltpu.PrefetchScalarGridSpec(
            num_scalar_prefetch=0,
            grid=grid,
            in_specs=[
                pl.BlockSpec((batch_tile, Din), lambda i: (i, 0)),   # x tile
                # Constant-index operands: weights/biases stay VMEM-resident across
                # the whole batch grid.  (For much larger hidden sizes on v7x's
                # 64 MiB VMEM, mark these pipeline_mode=pl.Buffered(1) to drop the
                # redundant second buffer; at 256x256 it is negligible.)
                pl.BlockSpec((Din, H1), lambda i: (0, 0)),           # w1
                pl.BlockSpec((1, H1), lambda i: (0, 0)),             # b1
                pl.BlockSpec((H1, H2), lambda i: (0, 0)),            # w2
                pl.BlockSpec((1, H2), lambda i: (0, 0)),             # b2
                pl.BlockSpec((H2, Dout), lambda i: (0, 0)),          # w3 (unpadded)
                pl.BlockSpec((1, Dout), lambda i: (0, 0)),           # b3 (unpadded)
            ],
            out_specs=pl.BlockSpec((batch_tile, Dout), lambda i: (i, 0)),
        ),
        compiler_params=pltpu.CompilerParams(
            dimension_semantics=("parallel",),
            vmem_limit_bytes=vmem_limit,
        ),
        cost_estimate=cost,
    )(x, w1c, b1r, w2c, b2r, w3c, b3r)


def init_params(key, dim_input, dim_output, layers=(256, 256)):
    """Deterministic init matching the module's parameter shapes.

    PyTorch Linear stores weight as (out, in); we generate in that shape then
    transpose to (in, out) for the kernel's x @ W layout.
    """
    dims = [dim_input] + list(layers) + [dim_output]
    params = {}
    for i in range(len(dims) - 1):
        k_w, k_b, key = jax.random.split(key, 3)
        fan_in, fan_out = dims[i], dims[i + 1]
        bound = 1.0 / jnp.sqrt(fan_in)
        w_torch = jax.random.uniform(k_w, (fan_out, fan_in), jnp.float32, -bound, bound)
        b = jax.random.uniform(k_b, (fan_out,), jnp.float32, -bound, bound)
        params[f"w{i + 1}"] = w_torch.T  # (in, out)
        params[f"b{i + 1}"] = b
    return params


def _reference(x, params):
    h = jnp.maximum(x @ params["w1"] + params["b1"], 0.0)
    h = jnp.maximum(h @ params["w2"] + params["b2"], 0.0)
    return h @ params["w3"] + params["b3"]


if __name__ == "__main__":
    key = jax.random.PRNGKey(0)
    dim_input, dim_output = 32, 10
    batch = 8

    k_x, k_x2, k_p = jax.random.split(key, 3)
    params = init_params(k_p, dim_input, dim_output, layers=(256, 256))
    x = jax.random.normal(k_x, (batch, dim_input), jnp.float32)
    ref = _reference(x, params)

    # f32 MXU operands: exact match with the reference.
    out_f32 = jax.block_until_ready(fc_network(x, params, compute_dtype=jnp.float32))
    assert out_f32.shape == (batch, dim_output)
    assert jnp.allclose(out_f32, ref, atol=1e-5, rtol=1e-5)

    # Default path: bf16 MXU operands, f32 accumulation -> loose tolerance.
    out_bf16 = jax.block_until_ready(fc_network(x, params))
    assert out_bf16.shape == (batch, dim_output)
    assert jnp.allclose(out_bf16, ref, atol=5e-2, rtol=5e-2)

    # Multi-step grid with a ragged last block (B % batch_tile != 0): exercises
    # Pallas boundary-block masking (no wrapper row padding / output slicing).
    x2 = jax.random.normal(k_x2, (40, dim_input), jnp.float32)
    ref2 = _reference(x2, params)
    out2 = jax.block_until_ready(
        fc_network(x2, params, batch_tile=16, compute_dtype=jnp.float32))
    assert out2.shape == (40, dim_output)
    assert jnp.allclose(out2, ref2, atol=1e-5, rtol=1e-5)

    # bf16 default with a user tile of 8: wrapper rounds it to the 16-row bf16
    # sublane packing, grid > 1, ragged tail -- the previously untested case.
    out3 = jax.block_until_ready(fc_network(x2, params, batch_tile=8))
    assert out3.shape == (40, dim_output)
    assert jnp.allclose(out3, ref2, atol=5e-2, rtol=5e-2)

    print("KERNEL_OK")
</pallas_src>

<mosaic_0001>
module attributes {stable_mosaic.version = 11 : i64} {
  func.func @_fc_kernel(%arg0: i32, %arg1: memref<8x32xf32, #tpu.memory_space<vmem>>, %arg2: memref<32x256xf32, #tpu.memory_space<vmem>>, %arg3: memref<1x256xf32, #tpu.memory_space<vmem>>, %arg4: memref<256x256xf32, #tpu.memory_space<vmem>>, %arg5: memref<1x256xf32, #tpu.memory_space<vmem>>, %arg6: memref<256x10xf32, #tpu.memory_space<vmem>>, %arg7: memref<1x10xf32, #tpu.memory_space<vmem>>, %arg8: memref<8x10xf32, #tpu.memory_space<vmem>>) attributes {dimension_semantics = [#tpu.dimension_semantics<parallel>], iteration_bounds = array<i64: 1>, scalar_prefetch = 0 : i64, scratch_operands = 0 : i64, tpu.core_type = #tpu.core_type<tc>, window_params = [{transform_indices = @transform_0, window_bounds = array<i64: 8, 32>}, {pipeline_mode = #tpu.pipeline_mode<synchronous>, transform_indices = @transform_1, window_bounds = array<i64: 32, 256>}, {pipeline_mode = #tpu.pipeline_mode<synchronous>, transform_indices = @transform_2, window_bounds = array<i64: 1, 256>}, {pipeline_mode = #tpu.pipeline_mode<synchronous>, transform_indices = @transform_3, window_bounds = array<i64: 256, 256>}, {pipeline_mode = #tpu.pipeline_mode<synchronous>, transform_indices = @transform_4, window_bounds = array<i64: 1, 256>}, {pipeline_mode = #tpu.pipeline_mode<synchronous>, transform_indices = @transform_5, window_bounds = array<i64: 256, 10>}, {pipeline_mode = #tpu.pipeline_mode<synchronous>, transform_indices = @transform_6, window_bounds = array<i64: 1, 10>}, {transform_indices = @transform_7, window_bounds = array<i64: 8, 10>}]} {
    %c0 = arith.constant 0 : index
    %c0_0 = arith.constant 0 : index
    %0 = vector.load %arg1[%c0, %c0_0] : memref<8x32xf32, #tpu.memory_space<vmem>>, vector<8x32xf32>
    %c0_1 = arith.constant 0 : index
    %c0_2 = arith.constant 0 : index
    %1 = vector.load %arg2[%c0_1, %c0_2] : memref<32x256xf32, #tpu.memory_space<vmem>>, vector<32x256xf32>
    %cst = arith.constant dense<0.000000e+00> : vector<8x256xf32>
    %2 = tpu.matmul %0, %1, %cst {dimension_numbers = #tpu.dot_dimension_numbers<[1], [0], [0], [1], [0, 0, 1, 1], [], []>} : vector<8x32xf32>, vector<32x256xf32>, vector<8x256xf32> -> vector<8x256xf32>
    %c0_3 = arith.constant 0 : index
    %c0_4 = arith.constant 0 : index
    %3 = vector.load %arg3[%c0_3, %c0_4] : memref<1x256xf32, #tpu.memory_space<vmem>>, vector<1x256xf32>
    %4 = vector.broadcast %3 : vector<1x256xf32> to vector<8x256xf32>
    %5 = arith.addf %2, %4 : vector<8x256xf32>
    %cst_5 = arith.constant 0.000000e+00 : f32
    %6 = vector.broadcast %cst_5 : f32 to vector<8x256xf32>
    %7 = arith.maximumf %5, %6 : vector<8x256xf32>
    %c0_6 = arith.constant 0 : index
    %c0_7 = arith.constant 0 : index
    %8 = vector.load %arg4[%c0_6, %c0_7] : memref<256x256xf32, #tpu.memory_space<vmem>>, vector<256x256xf32>
    %cst_8 = arith.constant dense<0.000000e+00> : vector<8x256xf32>
    %9 = tpu.matmul %7, %8, %cst_8 {dimension_numbers = #tpu.dot_dimension_numbers<[1], [0], [0], [1], [0, 0, 1, 1], [], []>} : vector<8x256xf32>, vector<256x256xf32>, vector<8x256xf32> -> vector<8x256xf32>
    %c0_9 = arith.constant 0 : index
    %c0_10 = arith.constant 0 : index
    %10 = vector.load %arg5[%c0_9, %c0_10] : memref<1x256xf32, #tpu.memory_space<vmem>>, vector<1x256xf32>
    %11 = vector.broadcast %10 : vector<1x256xf32> to vector<8x256xf32>
    %12 = arith.addf %9, %11 : vector<8x256xf32>
    %cst_11 = arith.constant 0.000000e+00 : f32
    %13 = vector.broadcast %cst_11 : f32 to vector<8x256xf32>
    %14 = arith.maximumf %12, %13 : vector<8x256xf32>
    %c0_12 = arith.constant 0 : index
    %c0_13 = arith.constant 0 : index
    %15 = vector.load %arg6[%c0_12, %c0_13] : memref<256x10xf32, #tpu.memory_space<vmem>>, vector<256x10xf32>
    %cst_14 = arith.constant dense<0.000000e+00> : vector<8x10xf32>
    %16 = tpu.matmul %14, %15, %cst_14 {dimension_numbers = #tpu.dot_dimension_numbers<[1], [0], [0], [1], [0, 0, 1, 1], [], []>} : vector<8x256xf32>, vector<256x10xf32>, vector<8x10xf32> -> vector<8x10xf32>
    %c0_15 = arith.constant 0 : index
    %c0_16 = arith.constant 0 : index
    %17 = vector.load %arg7[%c0_15, %c0_16] : memref<1x10xf32, #tpu.memory_space<vmem>>, vector<1x10xf32>
    %18 = vector.broadcast %17 : vector<1x10xf32> to vector<8x10xf32>
    %19 = arith.addf %16, %18 : vector<8x10xf32>
    %c0_17 = arith.constant 0 : index
    %c0_18 = arith.constant 0 : index
    %20 = vector.load %arg8[%c0_17, %c0_18] : memref<8x10xf32, #tpu.memory_space<vmem>>, vector<8x10xf32>
    tpu.vector_store %arg8[%c0_17, %c0_18], %19 {strides = array<i32>} : memref<8x10xf32, #tpu.memory_space<vmem>>, vector<8x10xf32>,
    return
  }
  func.func @transform_0(%arg0: i32) -> (i32, i32) {
    %c0_i32 = arith.constant 0 : i32
    %c0_i32_0 = arith.constant 0 : i32
    return %arg0, %c0_i32 : i32, i32
  }
  func.func @transform_1(%arg0: i32) -> (i32, i32) {
    %c0_i32 = arith.constant 0 : i32
    %c0_i32_0 = arith.constant 0 : i32
    %c0_i32_1 = arith.constant 0 : i32
    return %c0_i32, %c0_i32_0 : i32, i32
  }
  func.func @transform_2(%arg0: i32) -> (i32, i32) {
    %c0_i32 = arith.constant 0 : i32
    %c0_i32_0 = arith.constant 0 : i32
    %c0_i32_1 = arith.constant 0 : i32
    return %c0_i32, %c0_i32_0 : i32, i32
  }
  func.func @transform_3(%arg0: i32) -> (i32, i32) {
    %c0_i32 = arith.constant 0 : i32
    %c0_i32_0 = arith.constant 0 : i32
    %c0_i32_1 = arith.constant 0 : i32
    return %c0_i32, %c0_i32_0 : i32, i32
  }
  func.func @transform_4(%arg0: i32) -> (i32, i32) {
    %c0_i32 = arith.constant 0 : i32
    %c0_i32_0 = arith.constant 0 : i32
    %c0_i32_1 = arith.constant 0 : i32
    return %c0_i32, %c0_i32_0 : i32, i32
  }
  func.func @transform_5(%arg0: i32) -> (i32, i32) {
    %c0_i32 = arith.constant 0 : i32
    %c0_i32_0 = arith.constant 0 : i32
    %c0_i32_1 = arith.constant 0 : i32
    return %c0_i32, %c0_i32_0 : i32, i32
  }
  func.func @transform_6(%arg0: i32) -> (i32, i32) {
    %c0_i32 = arith.constant 0 : i32
    %c0_i32_0 = arith.constant 0 : i32
    %c0_i32_1 = arith.constant 0 : i32
    return %c0_i32, %c0_i32_0 : i32, i32
  }
  func.func @transform_7(%arg0: i32) -> (i32, i32) {
    %c0_i32 = arith.constant 0 : i32
    %c0_i32_0 = arith.constant 0 : i32
    return %arg0, %c0_i32 : i32, i32
  }
}

</mosaic_0001>

<bundles_post_ra>
// kernel: tpu_custom_call.1
= control target key start
LH: loop header
LB: loop body
LE: loop exit
PB: predicated region body
PF: predicated region fallthrough
CT: control target
= control target key end

     0   :  { %12 = vsyncpa [#allocation3], 0  ;;  %s809_s0 = inlined_call_operand.vmem [shape: f32[8,32], index: 0, kind: input, shape index: {}]   ;;  %s810_s1 = inlined_call_operand.vmem [shape: f32[32,256], index: 1, kind: input, shape index: {}]   ;;  %s811_s2 = inlined_call_operand.vmem [shape: f32[1,256], index: 2, kind: input, shape index: {}]   ;;  %s812_s3 = inlined_call_operand.hbm [shape: f32[256,256], index: 3, kind: input, shape index: {}]   ;;  %s813_s4 = inlined_call_operand.vmem [shape: f32[1,256], index: 4, kind: input, shape index: {}]   ;;  %s814_s5 = inlined_call_operand.vmem [shape: f32[256,10], index: 5, kind: input, shape index: {}]   ;;  %s815_s6 = inlined_call_operand.vmem [shape: f32[1,10], index: 6, kind: input, shape index: {}]   ;;  %s816_s7 = inlined_call_operand.hbm [shape: f32[8,10], index: 7, kind: output, shape index: {}]  }
   0x1   :  { %13 = vsyncpa [#allocation4], 0  ;;  %s608_s24 = smov [#allocation2]   ;;  %s560_s28 = scalar_lea.hbm %s812_s3, 8192 }
   0x2   :  { %s25_s25 = sshll.u32 %s608_s24, 4  ;;  %p561_p0 = scmp.ne.s32.totalorder %s812_s3, %s560_s28  ;;  %s26_s25 = int_to_ptr.vmem [resolvable:$true] %s25_s25 }
   0x3   :  { %p564_p1 = scmp.lt.u32.totalorder %s560_s28, %s812_s3 }
   0x5   :  { %p566_p2 = pnand %p564_p1, %p561_p0 }
   0x7   :  { %569 = shalt.err (!%p566_p2)
}
   0x8   :  { %s570_s10 = scalar_lea.vmem %s26_s25, 8192  ;;  %p575_p4 = scmp.lt.s32.totalorder %s26_s25, %s26_s25 }
   0x9   :  { %p571_p3 = scmp.ne.s32.totalorder %s26_s25, %s570_s10  ;;  %p576_p5 = scmp.lt.s32.totalorder %s570_s10, %s570_s10 }
   0xb   :  { %p577_p6 = por %p576_p5, %p575_p4 }
   0xd   :  { %p578_p7 = pnand %p577_p6, %p571_p3 }
   0xf   :  { %581 = shalt.err (!%p578_p7)
}
  0x10   :  { %s609_s11 = smov 256   ;;  %s610_s12 = smov 16  }
  0x11   :  { %31 = dma.hbm_to_vmem [thread:$0]  %s812_s3, 8192, %s26_s25, [#allocation3], %s609_s11, %s609_s11, %s610_s12  }
  0x12   :  { %604 = dma.done.wait [#allocation3], 8192  }
  0x13   :  { %605 = vsyncadd [#allocation3], 4294959104  ;;  %v611_v0 = vmov 0.0   ;;  %v43_v1 = vld [vmem:[%s810_s1 + $0x8] sm:$0xff]  ;;  %v45_v2 = vld [vmem:[%s810_s1 + $0x18] sm:$0xff]  ;;  %vm62_vm0 = vcmask 261120  }
  0x14   :  { %130 = vmatprep.mubr.f32.mxu0 %v611_v0  ;;  %v42_v3 = vld [vmem:[%s810_s1] sm:$0xff]  ;;  %v451_v4 = vpack.c.bf16 %v45_v2, %v43_v1  ;;  %v44_v5 = vld [vmem:[%s810_s1 + $0x10] sm:$0xff]  ;;  %v47_v6 = vld [vmem:[%s810_s1 + $0x28] sm:$0xff]  ;;  %s612_s3 = smov [#allocation5]   ;;  %vm397_vm1 = vcmask 80896  }
  0x15   :  { %v49_v7 = vld [vmem:[%s810_s1 + $0x38] sm:$0xff]  ;;  %v453_v8 = vpack.c.bf16 %v44_v5, %v42_v3  ;;  %v46_v10 = vld [vmem:[%s810_s1 + $0x20] sm:$0xff]  ;;  %v48_v11 = vld [vmem:[%s810_s1 + $0x30] sm:$0xff]  ;;  %s405_s23 = sshll.u32 %s612_s3, 4  ;;  %s406_s23 = int_to_ptr.vmem [resolvable:$true] %s405_s23 }
  0x16   :  { %v455_v9 = vpack.c.bf16 %v49_v7, %v47_v6  ;;  %452 = vmatprep.subr.bf16.mxu0 %v451_v4  ;;  %v140_v12 = vld [vmem:[#allocation2 + $0x8] sm:$0xff]  ;;  %v142_v13 = vld [vmem:[#allocation2 + $0x18] sm:$0xff]  ;;  %v139_v14 = vld [vmem:[#allocation2] sm:$0xff]  ;;  %v457_v15 = vpack.c.bf16 %v48_v11, %v46_v10  ;;  %p587_p9 = scmp.lt.s32.totalorder %s406_s23, %s406_s23 }
  0x17   :  { %454 = vmatpush1.bf16.msra.mxu0 %v453_v8  ;;  %v459_v16 = vpack.c.bf16 %v142_v13, %v140_v12  ;;  %v141_v17 = vld [vmem:[#allocation2 + $0x10] sm:$0xff]  ;;  %v144_v18 = vld [vmem:[#allocation2 + $0x28] sm:$0xff]  ;;  %v146_v19 = vld [vmem:[#allocation2 + $0x38] sm:$0xff] }
  0x18   :  { %456 = vmatprep.subr.bf16.mxu0 %v455_v9  ;;  %v461_v20 = vpack.c.bf16 %v141_v17, %v139_v14  ;;  %v463_v21 = vpack.c.bf16 %v146_v19, %v144_v18  ;;  %v143_v22 = vld [vmem:[#allocation2 + $0x20] sm:$0xff]  ;;  %v145_v23 = vld [vmem:[#allocation2 + $0x30] sm:$0xff]  ;;  %v148_v24 = vld [vmem:[#allocation2 + $0x48] sm:$0xff] }
  0x19   :  { %460 = vmatprep.subr.bf16.mxu1 %v459_v16  ;;  %v150_v25 = vld [vmem:[#allocation2 + $0x58] sm:$0xff]  ;;  %v465_v26 = vpack.c.bf16 %v145_v23, %v143_v22  ;;  %v41_v27 = vld [vmem:[%s809_s0] sm:$0xff]  ;;  %v149_v30 = vld [vmem:[#allocation2 + $0x50] sm:$0xff] }
  0x1a   :  { %462 = vmatpush1.bf16.msra.mxu1 %v461_v20  ;;  %v467_v28 = vpack.c.bf16 %v150_v25, %v148_v24  ;;  %v147_v29 = vld [vmem:[#allocation2 + $0x40] sm:$0xff]  ;;  %v152_v31 = vld [vmem:[#allocation2 + $0x68] sm:$0xff]  ;;  %v154_v32 = vld [vmem:[#allocation2 + $0x78] sm:$0xff] }
  0x1b   :  { %458 = vmatpush1.bf16.msra.mxu0 %v457_v15  ;;  %464 = vmatprep.subr.bf16.mxu1 %v463_v21  ;;  %v469_v33 = vpack.c.bf16 %v149_v30, %v147_v29  ;;  %v471_v34 = vpack.c.bf16 %v154_v32, %v152_v31  ;;  %v151_v35 = vld [vmem:[#allocation2 + $0x60] sm:$0xff]  ;;  %v153_v36 = vld [vmem:[#allocation2 + $0x70] sm:$0xff]  ;;  %v156_v37 = vld [vmem:[#allocation2 + $0x88] sm:$0xff] }
  0x1c   :  { %v158_v38 = vld [vmem:[#allocation2 + $0x98] sm:$0xff]  ;;  %v473_v39 = vpack.c.bf16 %v153_v36, %v151_v35  ;;  %v155_v41 = vld [vmem:[#allocation2 + $0x80] sm:$0xff]  ;;  %v157_v42 = vld [vmem:[#allocation2 + $0x90] sm:$0xff] }
  0x1d   :  { %v475_v40 = vpack.c.bf16 %v158_v38, %v156_v37  ;;  %v160_v43 = vld [vmem:[#allocation2 + $0xa8] sm:$0xff]  ;;  %v162_v44 = vld [vmem:[#allocation2 + $0xb8] sm:$0xff]  ;;  %v477_v45 = vpack.c.bf16 %v157_v42, %v155_v41  ;;  %v159_v47 = vld [vmem:[#allocation2 + $0xa0] sm:$0xff] }
  0x1e   :  { %414 = vmatmul.mubr.msk.f32.vlgmr.msra.gmra.mrb[0].mxu0 %vm62_vm0, %v41_v27  ;;  %466 = vmatpush1.bf16.msra.mxu1 %v465_v26  ;;  %v479_v46 = vpack.c.bf16 %v162_v44, %v160_v43  ;;  %v161_v48 = vld [vmem:[#allocation2 + $0xb0] sm:$0xff]  ;;  %v164_v49 = vld [vmem:[#allocation2 + $0xc8] sm:$0xff]  ;;  %v166_v50 = vld [vmem:[#allocation2 + $0xd8] sm:$0xff] }
  0x1f   :  { %468 = vmatprep.subr.bf16.mxu1 %v467_v28  ;;  %v481_v51 = vpack.c.bf16 %v161_v48, %v159_v47  ;;  %v483_v52 = vpack.c.bf16 %v166_v50, %v164_v49  ;;  %v163_v53 = vld [vmem:[#allocation2 + $0xc0] sm:$0xff]  ;;  %v165_v54 = vld [vmem:[#allocation2 + $0xd0] sm:$0xff]  ;;  %v168_v55 = vld [vmem:[#allocation2 + $0xe8] sm:$0xff] }
  0x20   :  { %v170_v56 = vld [vmem:[#allocation2 + $0xf8] sm:$0xff]  ;;  %v485_v57 = vpack.c.bf16 %v165_v54, %v163_v53  ;;  %v167_v59 = vld [vmem:[#allocation2 + $0xe0] sm:$0xff]  ;;  %v169_v60 = vld [vmem:[#allocation2 + $0xf0] sm:$0xff] }
  0x21   :  { %v487_v58 = vpack.c.bf16 %v170_v56, %v168_v55  ;;  %v172_v61 = vld [vmem:[#allocation2 + $0x108] sm:$0xff]  ;;  %v174_v62 = vld [vmem:[#allocation2 + $0x118] sm:$0xff]  ;;  %v489_v63 = vpack.c.bf16 %v169_v60, %v167_v59  ;;  %v171_v1 = vld [vmem:[#allocation2 + $0x100] sm:$0xff] }
  0x22   :  { %470 = vmatpush1.bf16.msra.mxu1 %v469_v33  ;;  %v491_v0 = vpack.c.bf16 %v174_v62, %v172_v61  ;;  %v173_v2 = vld [vmem:[#allocation2 + $0x110] sm:$0xff]  ;;  %v176_v3 = vld [vmem:[#allocation2 + $0x128] sm:$0xff]  ;;  %v178_v4 = vld [vmem:[#allocation2 + $0x138] sm:$0xff] }
  0x23   :  { %472 = vmatprep.subr.bf16.mxu1 %v471_v34  ;;  %v493_v5 = vpack.c.bf16 %v173_v2, %v171_v1  ;;  %v495_v6 = vpack.c.bf16 %v178_v4, %v176_v3  ;;  %v175_v7 = vld [vmem:[#allocation2 + $0x120] sm:$0xff]  ;;  %v177_v8 = vld [vmem:[#allocation2 + $0x130] sm:$0xff]  ;;  %v180_v9 = vld [vmem:[#allocation2 + $0x148] sm:$0xff] }
  0x24   :  { %v182_v10 = vld [vmem:[#allocation2 + $0x158] sm:$0xff]  ;;  %v497_v11 = vpack.c.bf16 %v177_v8, %v175_v7  ;;  %v179_v13 = vld [vmem:[#allocation2 + $0x140] sm:$0xff]  ;;  %v181_v14 = vld [vmem:[#allocation2 + $0x150] sm:$0xff] }
  0x25   :  { %v499_v12 = vpack.c.bf16 %v182_v10, %v180_v9  ;;  %v184_v15 = vld [vmem:[#allocation2 + $0x168] sm:$0xff]  ;;  %v186_v16 = vld [vmem:[#allocation2 + $0x178] sm:$0xff]  ;;  %v501_v17 = vpack.c.bf16 %v181_v14, %v179_v13  ;;  %v183_v19 = vld [vmem:[#allocation2 + $0x160] sm:$0xff] }
  0x26   :  { %474 = vmatpush1.bf16.msra.mxu1 %v473_v39  ;;  %v503_v18 = vpack.c.bf16 %v186_v16, %v184_v15  ;;  %v185_v20 = vld [vmem:[#allocation2 + $0x170] sm:$0xff]  ;;  %v188_v21 = vld [vmem:[#allocation2 + $0x188] sm:$0xff]  ;;  %v190_v22 = vld [vmem:[#allocation2 + $0x198] sm:$0xff] }
  0x27   :  { %476 = vmatprep.subr.bf16.mxu1 %v475_v40  ;;  %v505_v23 = vpack.c.bf16 %v185_v20, %v183_v19  ;;  %v507_v24 = vpack.c.bf16 %v190_v22, %v188_v21  ;;  %v187_v25 = vld [vmem:[#allocation2 + $0x180] sm:$0xff]  ;;  %v189_v26 = vld [vmem:[#allocation2 + $0x190] sm:$0xff]  ;;  %v192_v27 = vld [vmem:[#allocation2 + $0x1a8] sm:$0xff]  ;;  %v52_v21 = vlaneseq }
  0x28   :  { %v194_v28 = vld [vmem:[#allocation2 + $0x1b8] sm:$0xff]  ;;  %v509_v29 = vpack.c.bf16 %v189_v26, %v187_v25  ;;  %v191_v31 = vld [vmem:[#allocation2 + $0x1a0] sm:$0xff]  ;;  %v193_v32 = vld [vmem:[#allocation2 + $0x1b0] sm:$0xff] }
  0x29   :  { %v511_v30 = vpack.c.bf16 %v194_v28, %v192_v27  ;;  %v196_v33 = vld [vmem:[#allocation2 + $0x1c8] sm:$0xff]  ;;  %v198_v34 = vld [vmem:[#allocation2 + $0x1d8] sm:$0xff]  ;;  %v513_v35 = vpack.c.bf16 %v193_v32, %v191_v31  ;;  %v195_v37 = vld [vmem:[#allocation2 + $0x1c0] sm:$0xff]  ;;  %v53_v22 = vshrl.u32 %v52_v21, 7 }
  0x2a   :  { %478 = vmatpush1.bf16.msra.mxu1 %v477_v45  ;;  %v515_v36 = vpack.c.bf16 %v198_v34, %v196_v33  ;;  %v197_v38 = vld [vmem:[#allocation2 + $0x1d0] sm:$0xff]  ;;  %v200_v40 = vld [vmem:[#allocation2 + $0x1e8] sm:$0xff]  ;;  %v202_v41 = vld [vmem:[#allocation2 + $0x1f8] sm:$0xff] }
  0x2b   :  { %480 = vmatprep.subr.bf16.mxu1 %v479_v46  ;;  %v517_v39 = vpack.c.bf16 %v197_v38, %v195_v37  ;;  %v519_v42 = vpack.c.bf16 %v202_v41, %v200_v40  ;;  %v199_v43 = vld [vmem:[#allocation2 + $0x1e0] sm:$0xff]  ;;  %v201_v44 = vld [vmem:[#allocation2 + $0x1f0] sm:$0xff]  ;;  %v305_v47 = vld [vmem:[%s814_s5 + $0x88] sm:$0xff]  ;;  %v58_v25 = vsub.s32 1, %v53_v22 }
  0x2c   :  { %v521_v45 = vpack.c.bf16 %v201_v44, %v199_v43  ;;  %v304_v46 = vld [vmem:[%s814_s5 + $0x80] sm:$0xff]  ;;  %v289_v50 = vld [vmem:[%s814_s5 + $0x8] sm:$0xff]  ;;  %v290_v55 = vld [vmem:[%s814_s5 + $0x10] sm:$0xff] }
  0x2d   :  { %v288_v48 = vld [vmem:[%s814_s5] sm:$0xff]  ;;  %v523_v49 = vpack.c.bf16 %v305_v47, %v304_v46  ;;  %v291_v56 = vld [vmem:[%s814_s5 + $0x18] sm:$0xff]  ;;  %v293_v62 = vld [vmem:[%s814_s5 + $0x28] sm:$0xff] }
  0x2e   :  { %482 = vmatpush1.bf16.msra.mxu1 %v481_v51  ;;  %v306_v51 = vld [vmem:[%s814_s5 + $0x90] sm:$0xff]  ;;  %v525_v53 = vpack.c.bf16 %v289_v50, %v288_v48  ;;  %v529_v59 = vpack.c.bf16 %v291_v56, %v290_v55  ;;  %v292_v61 = vld [vmem:[%s814_s5 + $0x20] sm:$0xff]  ;;  %v295_v4 = vld [vmem:[%s814_s5 + $0x38] sm:$0xff] }
  0x2f   :  { %484 = vmatprep.subr.bf16.mxu1 %v483_v52  ;;  %v307_v52 = vld [vmem:[%s814_s5 + $0x98] sm:$0xff]  ;;  %524 = vmatprep.subr.bf16.mxu0 %v523_v49  ;;  %v533_v1 = vpack.c.bf16 %v293_v62, %v292_v61  ;;  %v294_v3 = vld [vmem:[%s814_s5 + $0x30] sm:$0xff]  ;;  %v296_v9 = vld [vmem:[%s814_s5 + $0x40] sm:$0xff] }
  0x30   :  { %v527_v54 = vpack.c.bf16 %v307_v52, %v306_v51  ;;  %526 = vmatpush3.bf16.msra.mxu0 %v525_v53  ;;  %v537_v7 = vpack.c.bf16 %v295_v4, %v294_v3  ;;  %v297_v10 = vld [vmem:[%s814_s5 + $0x48] sm:$0xff]  ;;  %v298_v15 = vld [vmem:[%s814_s5 + $0x50] sm:$0xff]  ;;  %v299_v16 = vld [vmem:[%s814_s5 + $0x58] sm:$0xff] }
  0x31   :  { %v541_v13 = vpack.c.bf16 %v297_v10, %v296_v9  ;;  %v545_v19 = vpack.c.bf16 %v299_v16, %v298_v15  ;;  %v300_v34 = vld [vmem:[%s814_s5 + $0x60] sm:$0xff]  ;;  %v318_v37 = vld [vmem:[%s814_s5 + $0xf0] sm:$0xff]  ;;  %v319_v38 = vld [vmem:[%s814_s5 + $0xf8] sm:$0xff] }
  0x32   :  { %486 = vmatpush1.bf16.msra.mxu1 %v485_v57  ;;  %v308_v57 = vld [vmem:[%s814_s5 + $0xa0] sm:$0xff]  ;;  %528 = vmatprep.subr.bf16.mxu0 %v527_v54  ;;  %v302_v40 = vld [vmem:[%s814_s5 + $0x70] sm:$0xff]  ;;  %v303_v41 = vld [vmem:[%s814_s5 + $0x78] sm:$0xff] }
  0x33   :  { %488 = vmatprep.subr.bf16.mxu1 %v487_v58  ;;  %v309_v58 = vld [vmem:[%s814_s5 + $0xa8] sm:$0xff]  ;;  %v203_v43 = vld [vmem:[%s813_s4] sm:$0x3]  ;;  %s582_s4 = scalar_lea.vmem %s406_s23, 128 }
  0x34   :  { %v531_v60 = vpack.c.bf16 %v309_v58, %v308_v57  ;;  %530 = vmatpush3.bf16.msra.mxu0 %v529_v59  ;;  %v415_v53 = vld [vmem:[%s815_s6] ss:$0 sm:$0xff]  ;;  %p583_p8 = scmp.ne.s32.totalorder %s406_s23, %s582_s4  ;;  %p588_p10 = scmp.lt.s32.totalorder %s582_s4, %s582_s4 }
  0x36   :  { %490 = vmatpush1.bf16.msra.mxu1 %v489_v63  ;;  %v310_v63 = vld [vmem:[%s814_s5 + $0xb0] sm:$0xff]  ;;  %532 = vmatprep.subr.bf16.mxu0 %v531_v60  ;;  %p589_p11 = por %p588_p10, %p587_p9 }
  0x37   :  { %492 = vmatprep.subr.bf16.mxu1 %v491_v0  ;;  %v311_v0 = vld [vmem:[%s814_s5 + $0xb8] sm:$0xff] }
  0x38   :  { %v535_v2 = vpack.c.bf16 %v311_v0, %v310_v63  ;;  %534 = vmatpush3.bf16.msra.mxu0 %v533_v1  ;;  %p590_p12 = pnand %p589_p11, %p583_p8 }
  0x3a   :  { %494 = vmatpush1.bf16.msra.mxu1 %v493_v5  ;;  %v312_v5 = vld [vmem:[%s814_s5 + $0xc0] sm:$0xff]  ;;  %536 = vmatprep.subr.bf16.mxu0 %v535_v2 }
  0x3b   :  { %496 = vmatprep.subr.bf16.mxu1 %v495_v6  ;;  %v313_v6 = vld [vmem:[%s814_s5 + $0xc8] sm:$0xff] }
  0x3c   :  { %v539_v8 = vpack.c.bf16 %v313_v6, %v312_v5  ;;  %538 = vmatpush3.bf16.msra.mxu0 %v537_v7 }
  0x3e   :  { %498 = vmatpush1.bf16.msra.mxu1 %v497_v11  ;;  %v314_v11 = vld [vmem:[%s814_s5 + $0xd0] sm:$0xff]  ;;  %540 = vmatprep.subr.bf16.mxu0 %v539_v8 }
  0x3f   :  { %500 = vmatprep.subr.bf16.mxu1 %v499_v12  ;;  %v315_v12 = vld [vmem:[%s814_s5 + $0xd8] sm:$0xff] }
  0x40   :  { %v543_v14 = vpack.c.bf16 %v315_v12, %v314_v11  ;;  %542 = vmatpush3.bf16.msra.mxu0 %v541_v13 }
  0x42   :  { %502 = vmatpush1.bf16.msra.mxu1 %v501_v17  ;;  %v316_v17 = vld [vmem:[%s814_s5 + $0xe0] sm:$0xff]  ;;  %544 = vmatprep.subr.bf16.mxu0 %v543_v14 }
  0x43   :  { %504 = vmatprep.subr.bf16.mxu1 %v503_v18  ;;  %v317_v18 = vld [vmem:[%s814_s5 + $0xe8] sm:$0xff] }
  0x44   :  { %v547_v20 = vpack.c.bf16 %v317_v18, %v316_v17  ;;  %546 = vmatpush3.bf16.msra.mxu0 %v545_v19 }
  0x46   :  { %506 = vmatpush1.bf16.msra.mxu1 %v505_v23  ;;  %548 = vmatprep.subr.bf16.mxu0 %v547_v20  ;;  %v54_v23 = vsub.s32 0, %v53_v22 }
  0x47   :  { %508 = vmatprep.subr.bf16.mxu1 %v507_v24  ;;  %v50_v24 = vld [vmem:[%s811_s2] sm:$0x3] }
  0x48   :  { %v55_v26 = vrot.slane %v50_v24, %v54_v23  ;;  %v59_v27 = vrot.slane %v50_v24, %v58_v25  ;;  %v208_v44 = vrot.slane %v203_v43, %v54_v23 }
  0x4a   :  { %510 = vmatpush1.bf16.msra.mxu1 %v509_v29 }
  0x4b   :  { %512 = vmatprep.subr.bf16.mxu1 %v511_v30 }
  0x4e   :  { %514 = vmatpush1.bf16.msra.mxu1 %v513_v35  ;;  %v301_v35 = vld [vmem:[%s814_s5 + $0x68] sm:$0xff] }
  0x4f   :  { %516 = vmatprep.subr.bf16.mxu1 %v515_v36  ;;  %v549_v36 = vpack.c.bf16 %v301_v35, %v300_v34 }
  0x51   :  { %550 = vmatpush3.bf16.msra.mxu0 %v549_v36 }
  0x52   :  { %518 = vmatpush1.bf16.msra.mxu1 %v517_v39  ;;  %v551_v39 = vpack.c.bf16 %v319_v38, %v318_v37 }
  0x53   :  { %520 = vmatprep.subr.bf16.mxu1 %v519_v42  ;;  %v553_v42 = vpack.c.bf16 %v303_v41, %v302_v40 }
  0x54   :  { %552 = vmatprep.subr.bf16.mxu0 %v551_v39 }
  0x55   :  { %554 = vmatpush3.bf16.msra.mxu0 %v553_v42 }
  0x56   :  { %522 = vmatpush1.bf16.msra.mxu1 %v521_v45  ;;  %v212_v45 = vrot.slane %v203_v43, %v58_v25 }
  0xf1   :  { %v132_v28 = vpop.f32.mrb[0].mxu0 }
  0xf2   :  { %v133_v29 = vadd.f32 %v132_v28, %v55_v26  ;;  %v134_v30 = vpop.f32.mrb[1].mxu0 }
  0xf3   :  { %v135_v31 = vadd.f32 %v134_v30, %v59_v27 }
  0xf4   :  { %v137_v33 = vmax.f32 %v133_v29, 0.0 }
  0xf5   :  { %v138_v32 = vmax.f32 %v135_v31, 0.0 }
  0xf7   :  { %279 = vmatprep.mubr.f32.mxu1 %v138_v32 }
  0xf8   :  { %280 = vmatmul.mubr.f32.vlgmr.msra.gmra.mrb[0].mxu1 %v137_v33 }
 0x1cb   :  { %v281_v46 = vpop.f32.mrb[0].mxu1 }
 0x1cc   :  { %v282_v47 = vadd.f32 %v281_v46, %v208_v44  ;;  %v283_v48 = vpop.f32.mrb[1].mxu1 }
 0x1cd   :  { %v284_v49 = vadd.f32 %v283_v48, %v212_v45 }
 0x1ce   :  { %v286_v51 = vmax.f32 %v282_v47, 0.0 }
 0x1cf   :  { %v287_v50 = vmax.f32 %v284_v49, 0.0 }
 0x1d1   :  { %391 = vmatprep.mubr.f32.mxu0 %v287_v50 }
 0x1d2   :  { %392 = vmatmul.mubr.f32.vlgmr.msra.gmra.mrb[2].mxu0 %v286_v51 }
 0x2a5   :  { %v448_v52 = vpop.f32.mrb[2].mxu0 }
 0x2a6   :  { %v449_v54 = vpop.f32.mrb[3].mxu0 }
 0x2a7   :  { %v450_v55 = vadd.f32 %v449_v54, %v448_v52 }
 0x2a9   :  { %v394_v56 = vadd.f32 %v450_v55, %v415_v53 }
 0x2ab   :  { %398 = vst.msk [vmem:[#allocation5] sm:$0xff] %vm397_vm1, %v394_v56 }
 0x2ac   :  { %593 = shalt.err (!%p590_p12)
}
 0x2ad   :  { %s594_s26 = scalar_lea.hbm %s816_s7, 128 }
 0x2ae   :  { %p595_p13 = scmp.ne.s32.totalorder %s816_s7, %s594_s26  ;;  %p598_p0 = scmp.lt.u32.totalorder %s594_s26, %s816_s7 }
 0x2b0   :  { %p600_p1 = pnand %p598_p0, %p595_p13 }
 0x2b2   :  { %603 = shalt.err (!%p600_p1)
}
 0x2b3   :  { %408 = dma.vmem_to_hbm [thread:$0]  %s406_s23, 128, %s816_s7, [#allocation4]  }
 0x2b4   :  { %606 = dma.done.wait [#allocation4], 128  }
 0x2b5   :  { %607 = vsyncadd [#allocation4], 4294967168 }
 0x2b6   :  { %412 = vsyncpa [#allocation3], 1 }
 0x2b7   :  { %413 = vsyncpa [#allocation4], 1 }

</bundles_post_ra>
